<compile_context>
chip_gen: v7x
topology: tpu7x:2x2x1
jax: 0.10.0
libtpu: 0.0.40
codegen_flags: <defaults>
</compile_context>

<pallas_src>
import functools

import jax
import jax.numpy as jnp
from jax.experimental import pallas as pl
from jax.experimental.pallas import tpu as pltpu  # noqa: F401  (TPU backend)

EPS = 1e-5
C_LANE = 128  # lane-dense channel padding


# --------------------------------------------------------------------------
# Pallas kernels
# --------------------------------------------------------------------------
def _inception_block_kernel(*refs, K_max, N, L, has_bottleneck, eps):
    """Fused InceptionBlock1d forward.

    refs (has_bottleneck=True):
      x_ref  : (N, L, C_LANE)   input, channels zero-padded to 128 lanes
      wb_ref : (C_LANE, B)      bottleneck 1x1 weights (padded rows zero)
      wc_ref : (K_max, B, C_LANE) combined branch-conv weights (taps zero-padded,
                                  each branch owns disjoint output columns)
      wp_ref : (C_LANE, C_LANE) maxpool-branch 1x1 weights (disjoint columns)
      g_ref  : (1, C_LANE)      BN gamma (zero on padded channels)
      b_ref  : (1, C_LANE)      BN beta  (zero on padded channels)
      o_ref  : (N, L, C_LANE)   output
    """
    if has_bottleneck:
        x_ref, wb_ref, wc_ref, wp_ref, g_ref, b_ref, o_ref = refs
    else:
        x_ref, wc_ref, wp_ref, g_ref, b_ref, o_ref = refs

    C = x_ref.shape[2]
    x3 = x_ref[...].astype(jnp.float32)                      # (N, L, C)
    x2 = x3.reshape(N * L, C)

    # ---- bottleneck 1x1 conv (single lane-dense-contraction matmul) -------
    if has_bottleneck:
        bott2 = jnp.dot(x2, wb_ref[...], preferred_element_type=jnp.float32)
        bott3 = bott2.reshape(N, L, wb_ref.shape[1])
    else:
        bott3 = x3
    B = bott3.shape[2]

    # ---- all kernel-size branches: one matmul per tap, 128-wide output ----
    pad = (K_max - 1) // 2                                    # odd K_max assumed
    if pad > 0:
        zpad = jnp.zeros((N, pad, B), jnp.float32)
        bp = jnp.concatenate([zpad, bott3, zpad], axis=1)     # zero-pad in VMEM
    else:
        bp = bott3
    acc = jnp.zeros((N * L, C), jnp.float32)
    for t in range(K_max):                                    # static, small
        col = bp[:, t:t + L, :].reshape(N * L, B)
        acc = acc + jnp.dot(col, wc_ref[t], preferred_element_type=jnp.float32)

    # ---- maxpool(3, stride 1, pad 1) + 1x1 conv branch ---------------------
    ninf = jnp.full((N, 1, C), -jnp.inf, jnp.float32)
    xp = jnp.concatenate([ninf, x3, ninf], axis=1)            # (N, L+2, C)
    pooled = jnp.maximum(jnp.maximum(xp[:, 0:L, :], xp[:, 1:L + 1, :]),
                         xp[:, 2:L + 2, :]).reshape(N * L, C)
    acc = acc + jnp.dot(pooled, wp_ref[...], preferred_element_type=jnp.float32)

    # ---- training-mode BatchNorm (single-pass batch stats) + ReLU ----------
    cnt = jnp.float32(N * L)
    mean = jnp.sum(acc, axis=0, keepdims=True) / cnt
    var = jnp.maximum(jnp.sum(acc * acc, axis=0, keepdims=True) / cnt
                      - mean * mean, 0.0)
    y = (acc - mean) * jax.lax.rsqrt(var + eps) * g_ref[...] + b_ref[...]
    o_ref[...] = jnp.maximum(y, 0.0).reshape(N, L, C).astype(o_ref.dtype)


def _shortcut_kernel(inp_ref, res_ref, w_ref, g_ref, b_ref, o_ref, *, N, L, eps):
    """Fused Shortcut1d: ReLU(res + BN(conv1x1(inp))), training-mode BN."""
    C = inp_ref.shape[2]
    inp = inp_ref[...].astype(jnp.float32).reshape(N * L, C)
    res = res_ref[...].astype(jnp.float32).reshape(N * L, C)
    y = jnp.dot(inp, w_ref[...], preferred_element_type=jnp.float32)
    cnt = jnp.float32(N * L)
    mean = jnp.sum(y, axis=0, keepdims=True) / cnt
    var = jnp.maximum(jnp.sum(y * y, axis=0, keepdims=True) / cnt
                      - mean * mean, 0.0)
    z = (y - mean) * jax.lax.rsqrt(var + eps) * g_ref[...] + b_ref[...]
    o_ref[...] = jnp.maximum(res + z, 0.0).reshape(N, L, C).astype(o_ref.dtype)


# --------------------------------------------------------------------------
# pallas_call wrappers
# --------------------------------------------------------------------------
def inception_block(x, blk, *, k_max):
    N, L, C = x.shape
    has_b = blk["wb"] is not None
    kernel = functools.partial(_inception_block_kernel, K_max=k_max, N=N, L=L,
                               has_bottleneck=has_b, eps=EPS)
    args = ([x, blk["wb"]] if has_b else [x]) + \
        [blk["wc"], blk["wp"], blk["gamma"], blk["beta"]]
    return pl.pallas_call(
        kernel,
        out_shape=jax.ShapeDtypeStruct((N, L, C), x.dtype),
    )(*args)


def shortcut(inp, res, sk):
    N, L, C = inp.shape
    kernel = functools.partial(_shortcut_kernel, N=N, L=L, eps=EPS)
    return pl.pallas_call(
        kernel,
        out_shape=jax.ShapeDtypeStruct((N, L, C), res.dtype),
    )(inp, res, sk["w"], sk["gamma"], sk["beta"])


# --------------------------------------------------------------------------
# Parameter initialization (deterministic, synthetic) — stored pre-padded /
# pre-combined so the kernels see lane-dense, already-fused weights.
# --------------------------------------------------------------------------
def _rand_w(key, k, cin, cout):
    scale = 1.0 / jnp.sqrt(jnp.float32(cin * k))
    return jax.random.normal(key, (k, cin, cout), jnp.float32) * scale


def init_params(key, input_channels, kss, depth, bottleneck_size, nb_filters):
    n_ks = len(kss) + 1
    c_out = n_ks * nb_filters
    k_max = max(kss)
    assert c_out <= C_LANE and input_channels <= C_LANE
    params = {"blocks": [], "shortcuts": []}

    for d in range(depth):
        ni = input_channels if d == 0 else c_out
        key, kb, kp, *kcs = jax.random.split(key, 3 + len(kss))
        blk = {}
        if bottleneck_size > 0:
            wb = _rand_w(kb, 1, ni, bottleneck_size)[0]        # (ni, B)
            blk["wb"] = jnp.zeros((C_LANE, bottleneck_size),
                                  jnp.float32).at[:ni].set(wb)
            b_in = bottleneck_size
            cin_branch = bottleneck_size
        else:
            blk["wb"] = None
            b_in = C_LANE
            cin_branch = ni
        # Combined per-tap branch weights: (k_max, b_in, C_LANE); branch i owns
        # output columns [i*F:(i+1)*F]; its K taps are centred inside K_max.
        wc = jnp.zeros((k_max, b_in, C_LANE), jnp.float32)
        for i, ks in enumerate(kss):
            w = _rand_w(kcs[i], ks, cin_branch, nb_filters)    # (ks, cin, F)
            t0 = (k_max - 1) // 2 - (ks - 1) // 2
            wc = wc.at[t0:t0 + ks, :cin_branch,
                       i * nb_filters:(i + 1) * nb_filters].set(w)
        blk["wc"] = wc
        # Maxpool-branch 1x1 conv, written into output columns [n_kss*F:c_out].
        wp = _rand_w(kp, 1, ni, nb_filters)[0]                 # (ni, F)
        blk["wp"] = jnp.zeros((C_LANE, C_LANE), jnp.float32).at[
            :ni, len(kss) * nb_filters:c_out].set(wp)
        blk["gamma"] = jnp.zeros((1, C_LANE), jnp.float32).at[:, :c_out].set(1.0)
        blk["beta"] = jnp.zeros((1, C_LANE), jnp.float32)
        params["blocks"].append(blk)

    for s in range(depth // 3):
        ni = input_channels if s == 0 else c_out
        key, k1 = jax.random.split(key)
        w = _rand_w(k1, 1, ni, c_out)[0]                       # (ni, c_out)
        params["shortcuts"].append({
            "w": jnp.zeros((C_LANE, C_LANE), jnp.float32).at[:ni, :c_out].set(w),
            "gamma": jnp.zeros((1, C_LANE), jnp.float32).at[:, :c_out].set(1.0),
            "beta": jnp.zeros((1, C_LANE), jnp.float32),
        })
    return params


# --------------------------------------------------------------------------
# Forward pass (mirrors InceptionBackbone.forward)
# --------------------------------------------------------------------------
def inception_backbone_fwd(x_ncl, params, *, depth, use_residual, kss, c_out):
    # TODO(synk): even kernel sizes in kss are not length-preserving in the
    # PyTorch conv helper; only odd kernel sizes are supported here.
    assert all(k % 2 == 1 for k in kss)
    k_max = max(kss)
    cin = x_ncl.shape[1]
    assert cin <= C_LANE

    x = jnp.transpose(x_ncl, (0, 2, 1))                        # NCL -> NLC
    x = jnp.pad(x, ((0, 0), (0, 0), (0, C_LANE - cin)))        # lane-dense channels

    input_res = x
    for d in range(depth):
        x = inception_block(x, params["blocks"][d], k_max=k_max)
        if use_residual and d % 3 == 2:
            x = shortcut(input_res, x, params["shortcuts"][d // 3])
            input_res = x

    x = x[:, :, :c_out]                                        # drop lane padding
    return jnp.transpose(x, (0, 2, 1))                         # NLC -> NCL


# --------------------------------------------------------------------------
if __name__ == "__main__":
    INPUT_CHANNELS = 4
    KSS = (5, 3)
    DEPTH = 3
    BOTTLENECK = 8
    NB_FILTERS = 8
    USE_RESIDUAL = True
    N, L = 2, 16
    n_ks = len(KSS) + 1
    C_OUT = n_ks * NB_FILTERS

    key = jax.random.PRNGKey(0)
    x = jax.random.normal(key, (N, INPUT_CHANNELS, L), jnp.float32)   # (N, C, L)

    params = init_params(jax.random.PRNGKey(42), INPUT_CHANNELS, KSS, DEPTH,
                         BOTTLENECK, NB_FILTERS)

    fwd = jax.jit(functools.partial(inception_backbone_fwd, depth=DEPTH,
                                    use_residual=USE_RESIDUAL, kss=KSS,
                                    c_out=C_OUT))
    out = jax.block_until_ready(fwd(x, params))

    assert out.shape == (N, C_OUT, L), out.shape
    assert bool(jnp.all(jnp.isfinite(out)))
    print("KERNEL_OK")
</pallas_src>

<mosaic_0001>
module attributes {stable_mosaic.version = 11 : i64} {
  func.func @_inception_block_kernel(%arg0: memref<2x16x128xf32, #tpu.memory_space<vmem>>, %arg1: memref<128x8xf32, #tpu.memory_space<vmem>>, %arg2: memref<5x8x128xf32, #tpu.memory_space<vmem>>, %arg3: memref<128x128xf32, #tpu.memory_space<vmem>>, %arg4: memref<1x128xf32, #tpu.memory_space<vmem>>, %arg5: memref<1x128xf32, #tpu.memory_space<vmem>>, %arg6: memref<2x16x128xf32, #tpu.memory_space<vmem>>) attributes {dimension_semantics = [], scalar_prefetch = 0 : i64, scratch_operands = 0 : i64, tpu.core_type = #tpu.core_type<tc>} {
    %c0 = arith.constant 0 : index
    %c0_0 = arith.constant 0 : index
    %c0_1 = arith.constant 0 : index
    %0 = vector.load %arg0[%c0, %c0_0, %c0_1] : memref<2x16x128xf32, #tpu.memory_space<vmem>>, vector<2x16x128xf32>
    %1 = vector.shape_cast %0 : vector<2x16x128xf32> to vector<32x128xf32>
    %c0_2 = arith.constant 0 : index
    %c0_3 = arith.constant 0 : index
    %2 = vector.load %arg1[%c0_2, %c0_3] : memref<128x8xf32, #tpu.memory_space<vmem>>, vector<128x8xf32>
    %cst = arith.constant dense<0.000000e+00> : vector<32x8xf32>
    %3 = tpu.matmul %1, %2, %cst {dimension_numbers = #tpu.dot_dimension_numbers<[1], [0], [0], [1], [0, 0, 1, 1], [], []>} : vector<32x128xf32>, vector<128x8xf32>, vector<32x8xf32> -> vector<32x8xf32>
    %4 = vector.shape_cast %3 : vector<32x8xf32> to vector<2x16x8xf32>
    %cst_4 = arith.constant 0.000000e+00 : f32
    %5 = vector.broadcast %cst_4 : f32 to vector<2x2x8xf32>
    %6 = tpu.concatenate %5, %4, %5 in 1 : vector<2x2x8xf32>, vector<2x16x8xf32>, vector<2x2x8xf32> -> vector<2x20x8xf32>
    %cst_5 = arith.constant 0.000000e+00 : f32
    %7 = vector.broadcast %cst_5 : f32 to vector<32x128xf32>
    %8 = vector.extract_strided_slice %6 {offsets = [0, 0, 0], sizes = [2, 16, 8], strides = [1, 1, 1]} : vector<2x20x8xf32> to vector<2x16x8xf32>
    %9 = vector.shape_cast %8 : vector<2x16x8xf32> to vector<32x8xf32>
    %c0_6 = arith.constant 0 : index
    %c0_7 = arith.constant 0 : index
    %c0_8 = arith.constant 0 : index
    %10 = vector.load %arg2[%c0_6, %c0_7, %c0_8] : memref<5x8x128xf32, #tpu.memory_space<vmem>>, vector<1x8x128xf32>
    %11 = vector.shape_cast %10 : vector<1x8x128xf32> to vector<8x128xf32>
    %cst_9 = arith.constant dense<0.000000e+00> : vector<32x128xf32>
    %12 = tpu.matmul %9, %11, %cst_9 {dimension_numbers = #tpu.dot_dimension_numbers<[1], [0], [0], [1], [0, 0, 1, 1], [], []>} : vector<32x8xf32>, vector<8x128xf32>, vector<32x128xf32> -> vector<32x128xf32>
    %13 = arith.addf %7, %12 : vector<32x128xf32>
    %14 = vector.extract_strided_slice %6 {offsets = [0, 1, 0], sizes = [2, 16, 8], strides = [1, 1, 1]} : vector<2x20x8xf32> to vector<2x16x8xf32>
    %15 = vector.shape_cast %14 : vector<2x16x8xf32> to vector<32x8xf32>
    %c1 = arith.constant 1 : index
    %c0_10 = arith.constant 0 : index
    %c0_11 = arith.constant 0 : index
    %16 = vector.load %arg2[%c1, %c0_10, %c0_11] : memref<5x8x128xf32, #tpu.memory_space<vmem>>, vector<1x8x128xf32>
    %17 = vector.shape_cast %16 : vector<1x8x128xf32> to vector<8x128xf32>
    %cst_12 = arith.constant dense<0.000000e+00> : vector<32x128xf32>
    %18 = tpu.matmul %15, %17, %cst_12 {dimension_numbers = #tpu.dot_dimension_numbers<[1], [0], [0], [1], [0, 0, 1, 1], [], []>} : vector<32x8xf32>, vector<8x128xf32>, vector<32x128xf32> -> vector<32x128xf32>
    %19 = arith.addf %13, %18 : vector<32x128xf32>
    %20 = vector.extract_strided_slice %6 {offsets = [0, 2, 0], sizes = [2, 16, 8], strides = [1, 1, 1]} : vector<2x20x8xf32> to vector<2x16x8xf32>
    %21 = vector.shape_cast %20 : vector<2x16x8xf32> to vector<32x8xf32>
    %c2 = arith.constant 2 : index
    %c0_13 = arith.constant 0 : index
    %c0_14 = arith.constant 0 : index
    %22 = vector.load %arg2[%c2, %c0_13, %c0_14] : memref<5x8x128xf32, #tpu.memory_space<vmem>>, vector<1x8x128xf32>
    %23 = vector.shape_cast %22 : vector<1x8x128xf32> to vector<8x128xf32>
    %cst_15 = arith.constant dense<0.000000e+00> : vector<32x128xf32>
    %24 = tpu.matmul %21, %23, %cst_15 {dimension_numbers = #tpu.dot_dimension_numbers<[1], [0], [0], [1], [0, 0, 1, 1], [], []>} : vector<32x8xf32>, vector<8x128xf32>, vector<32x128xf32> -> vector<32x128xf32>
    %25 = arith.addf %19, %24 : vector<32x128xf32>
    %26 = vector.extract_strided_slice %6 {offsets = [0, 3, 0], sizes = [2, 16, 8], strides = [1, 1, 1]} : vector<2x20x8xf32> to vector<2x16x8xf32>
    %27 = vector.shape_cast %26 : vector<2x16x8xf32> to vector<32x8xf32>
    %c3 = arith.constant 3 : index
    %c0_16 = arith.constant 0 : index
    %c0_17 = arith.constant 0 : index
    %28 = vector.load %arg2[%c3, %c0_16, %c0_17] : memref<5x8x128xf32, #tpu.memory_space<vmem>>, vector<1x8x128xf32>
    %29 = vector.shape_cast %28 : vector<1x8x128xf32> to vector<8x128xf32>
    %cst_18 = arith.constant dense<0.000000e+00> : vector<32x128xf32>
    %30 = tpu.matmul %27, %29, %cst_18 {dimension_numbers = #tpu.dot_dimension_numbers<[1], [0], [0], [1], [0, 0, 1, 1], [], []>} : vector<32x8xf32>, vector<8x128xf32>, vector<32x128xf32> -> vector<32x128xf32>
    %31 = arith.addf %25, %30 : vector<32x128xf32>
    %32 = vector.extract_strided_slice %6 {offsets = [0, 4, 0], sizes = [2, 16, 8], strides = [1, 1, 1]} : vector<2x20x8xf32> to vector<2x16x8xf32>
    %33 = vector.shape_cast %32 : vector<2x16x8xf32> to vector<32x8xf32>
    %c4 = arith.constant 4 : index
    %c0_19 = arith.constant 0 : index
    %c0_20 = arith.constant 0 : index
    %34 = vector.load %arg2[%c4, %c0_19, %c0_20] : memref<5x8x128xf32, #tpu.memory_space<vmem>>, vector<1x8x128xf32>
    %35 = vector.shape_cast %34 : vector<1x8x128xf32> to vector<8x128xf32>
    %cst_21 = arith.constant dense<0.000000e+00> : vector<32x128xf32>
    %36 = tpu.matmul %33, %35, %cst_21 {dimension_numbers = #tpu.dot_dimension_numbers<[1], [0], [0], [1], [0, 0, 1, 1], [], []>} : vector<32x8xf32>, vector<8x128xf32>, vector<32x128xf32> -> vector<32x128xf32>
    %37 = arith.addf %31, %36 : vector<32x128xf32>
    %cst_22 = arith.constant 0xFF800000 : f32
    %38 = vector.broadcast %cst_22 : f32 to vector<2x1x128xf32>
    %39 = tpu.concatenate %38, %0, %38 in 1 : vector<2x1x128xf32>, vector<2x16x128xf32>, vector<2x1x128xf32> -> vector<2x18x128xf32>
    %40 = vector.extract_strided_slice %39 {offsets = [0, 0, 0], sizes = [2, 16, 128], strides = [1, 1, 1]} : vector<2x18x128xf32> to vector<2x16x128xf32>
    %41 = vector.extract_strided_slice %39 {offsets = [0, 1, 0], sizes = [2, 16, 128], strides = [1, 1, 1]} : vector<2x18x128xf32> to vector<2x16x128xf32>
    %42 = arith.maximumf %40, %41 : vector<2x16x128xf32>
    %43 = vector.extract_strided_slice %39 {offsets = [0, 2, 0], sizes = [2, 16, 128], strides = [1, 1, 1]} : vector<2x18x128xf32> to vector<2x16x128xf32>
    %44 = arith.maximumf %42, %43 : vector<2x16x128xf32>
    %45 = vector.shape_cast %44 : vector<2x16x128xf32> to vector<32x128xf32>
    %c0_23 = arith.constant 0 : index
    %c0_24 = arith.constant 0 : index
    %46 = vector.load %arg3[%c0_23, %c0_24] : memref<128x128xf32, #tpu.memory_space<vmem>>, vector<128x128xf32>
    %cst_25 = arith.constant dense<0.000000e+00> : vector<32x128xf32>
    %47 = tpu.matmul %45, %46, %cst_25 {dimension_numbers = #tpu.dot_dimension_numbers<[1], [0], [0], [1], [0, 0, 1, 1], [], []>} : vector<32x128xf32>, vector<128x128xf32>, vector<32x128xf32> -> vector<32x128xf32>
    %48 = arith.addf %37, %47 : vector<32x128xf32>
    %cst_26 = arith.constant dense<0.000000e+00> : vector<128xf32>
    %49 = vector.multi_reduction <add>, %48, %cst_26 [0] : vector<32x128xf32> to vector<128xf32>
    %50 = vector.shape_cast %49 : vector<128xf32> to vector<1x128xf32>
    %cst_27 = arith.constant 3.200000e+01 : f32
    %51 = vector.broadcast %cst_27 : f32 to vector<1x128xf32>
    %52 = arith.divf %50, %51 : vector<1x128xf32>
    %53 = arith.mulf %48, %48 : vector<32x128xf32>
    %cst_28 = arith.constant dense<0.000000e+00> : vector<128xf32>
    %54 = vector.multi_reduction <add>, %53, %cst_28 [0] : vector<32x128xf32> to vector<128xf32>
    %55 = vector.shape_cast %54 : vector<128xf32> to vector<1x128xf32>
    %cst_29 = arith.constant 3.200000e+01 : f32
    %56 = vector.broadcast %cst_29 : f32 to vector<1x128xf32>
    %57 = arith.divf %55, %56 : vector<1x128xf32>
    %58 = arith.mulf %52, %52 : vector<1x128xf32>
    %59 = arith.subf %57, %58 : vector<1x128xf32>
    %cst_30 = arith.constant 0.000000e+00 : f32
    %60 = vector.broadcast %cst_30 : f32 to vector<1x128xf32>
    %61 = arith.maximumf %59, %60 : vector<1x128xf32>
    %62 = vector.broadcast %52 : vector<1x128xf32> to vector<32x128xf32>
    %63 = arith.subf %48, %62 : vector<32x128xf32>
    %cst_31 = arith.constant 9.99999974E-6 : f32
    %64 = vector.broadcast %cst_31 : f32 to vector<1x128xf32>
    %65 = arith.addf %61, %64 : vector<1x128xf32>
    %66 = math.rsqrt %65 : vector<1x128xf32>
    %67 = vector.broadcast %66 : vector<1x128xf32> to vector<32x128xf32>
    %68 = arith.mulf %63, %67 : vector<32x128xf32>
    %c0_32 = arith.constant 0 : index
    %c0_33 = arith.constant 0 : index
    %69 = vector.load %arg4[%c0_32, %c0_33] : memref<1x128xf32, #tpu.memory_space<vmem>>, vector<1x128xf32>
    %70 = vector.broadcast %69 : vector<1x128xf32> to vector<32x128xf32>
    %71 = arith.mulf %68, %70 : vector<32x128xf32>
    %c0_34 = arith.constant 0 : index
    %c0_35 = arith.constant 0 : index
    %72 = vector.load %arg5[%c0_34, %c0_35] : memref<1x128xf32, #tpu.memory_space<vmem>>, vector<1x128xf32>
    %73 = vector.broadcast %72 : vector<1x128xf32> to vector<32x128xf32>
    %74 = arith.addf %71, %73 : vector<32x128xf32>
    %cst_36 = arith.constant 0.000000e+00 : f32
    %75 = vector.broadcast %cst_36 : f32 to vector<32x128xf32>
    %76 = arith.maximumf %74, %75 : vector<32x128xf32>
    %77 = vector.shape_cast %76 : vector<32x128xf32> to vector<2x16x128xf32>
    %c0_37 = arith.constant 0 : index
    %c0_38 = arith.constant 0 : index
    %c0_39 = arith.constant 0 : index
    %78 = vector.load %arg6[%c0_37, %c0_38, %c0_39] : memref<2x16x128xf32, #tpu.memory_space<vmem>>, vector<2x16x128xf32>
    tpu.vector_store %arg6[%c0_37, %c0_38, %c0_39], %77 {strides = array<i32>} : memref<2x16x128xf32, #tpu.memory_space<vmem>>, vector<2x16x128xf32>,
    return
  }
}

module attributes {stable_mosaic.version = 11 : i64} {
  func.func @_shortcut_kernel(%arg0: memref<2x16x128xf32, #tpu.memory_space<vmem>>, %arg1: memref<2x16x128xf32, #tpu.memory_space<vmem>>, %arg2: memref<128x128xf32, #tpu.memory_space<vmem>>, %arg3: memref<1x128xf32, #tpu.memory_space<vmem>>, %arg4: memref<1x128xf32, #tpu.memory_space<vmem>>, %arg5: memref<2x16x128xf32, #tpu.memory_space<vmem>>) attributes {dimension_semantics = [], scalar_prefetch = 0 : i64, scratch_operands = 0 : i64, tpu.core_type = #tpu.core_type<tc>} {
    %c0 = arith.constant 0 : index
    %c0_0 = arith.constant 0 : index
    %c0_1 = arith.constant 0 : index
    %0 = vector.load %arg0[%c0, %c0_0, %c0_1] : memref<2x16x128xf32, #tpu.memory_space<vmem>>, vector<2x16x128xf32>
    %1 = vector.shape_cast %0 : vector<2x16x128xf32> to vector<32x128xf32>
    %c0_2 = arith.constant 0 : index
    %c0_3 = arith.constant 0 : index
    %c0_4 = arith.constant 0 : index
    %2 = vector.load %arg1[%c0_2, %c0_3, %c0_4] : memref<2x16x128xf32, #tpu.memory_space<vmem>>, vector<2x16x128xf32>
    %3 = vector.shape_cast %2 : vector<2x16x128xf32> to vector<32x128xf32>
    %c0_5 = arith.constant 0 : index
    %c0_6 = arith.constant 0 : index
    %4 = vector.load %arg2[%c0_5, %c0_6] : memref<128x128xf32, #tpu.memory_space<vmem>>, vector<128x128xf32>
    %cst = arith.constant dense<0.000000e+00> : vector<32x128xf32>
    %5 = tpu.matmul %1, %4, %cst {dimension_numbers = #tpu.dot_dimension_numbers<[1], [0], [0], [1], [0, 0, 1, 1], [], []>} : vector<32x128xf32>, vector<128x128xf32>, vector<32x128xf32> -> vector<32x128xf32>
    %cst_7 = arith.constant dense<0.000000e+00> : vector<128xf32>
    %6 = vector.multi_reduction <add>, %5, %cst_7 [0] : vector<32x128xf32> to vector<128xf32>
    %7 = vector.shape_cast %6 : vector<128xf32> to vector<1x128xf32>
    %cst_8 = arith.constant 3.200000e+01 : f32
    %8 = vector.broadcast %cst_8 : f32 to vector<1x128xf32>
    %9 = arith.divf %7, %8 : vector<1x128xf32>
    %10 = arith.mulf %5, %5 : vector<32x128xf32>
    %cst_9 = arith.constant dense<0.000000e+00> : vector<128xf32>
    %11 = vector.multi_reduction <add>, %10, %cst_9 [0] : vector<32x128xf32> to vector<128xf32>
    %12 = vector.shape_cast %11 : vector<128xf32> to vector<1x128xf32>
    %cst_10 = arith.constant 3.200000e+01 : f32
    %13 = vector.broadcast %cst_10 : f32 to vector<1x128xf32>
    %14 = arith.divf %12, %13 : vector<1x128xf32>
    %15 = arith.mulf %9, %9 : vector<1x128xf32>
    %16 = arith.subf %14, %15 : vector<1x128xf32>
    %cst_11 = arith.constant 0.000000e+00 : f32
    %17 = vector.broadcast %cst_11 : f32 to vector<1x128xf32>
    %18 = arith.maximumf %16, %17 : vector<1x128xf32>
    %19 = vector.broadcast %9 : vector<1x128xf32> to vector<32x128xf32>
    %20 = arith.subf %5, %19 : vector<32x128xf32>
    %cst_12 = arith.constant 9.99999974E-6 : f32
    %21 = vector.broadcast %cst_12 : f32 to vector<1x128xf32>
    %22 = arith.addf %18, %21 : vector<1x128xf32>
    %23 = math.rsqrt %22 : vector<1x128xf32>
    %24 = vector.broadcast %23 : vector<1x128xf32> to vector<32x128xf32>
    %25 = arith.mulf %20, %24 : vector<32x128xf32>
    %c0_13 = arith.constant 0 : index
    %c0_14 = arith.constant 0 : index
    %26 = vector.load %arg3[%c0_13, %c0_14] : memref<1x128xf32, #tpu.memory_space<vmem>>, vector<1x128xf32>
    %27 = vector.broadcast %26 : vector<1x128xf32> to vector<32x128xf32>
    %28 = arith.mulf %25, %27 : vector<32x128xf32>
    %c0_15 = arith.constant 0 : index
    %c0_16 = arith.constant 0 : index
    %29 = vector.load %arg4[%c0_15, %c0_16] : memref<1x128xf32, #tpu.memory_space<vmem>>, vector<1x128xf32>
    %30 = vector.broadcast %29 : vector<1x128xf32> to vector<32x128xf32>
    %31 = arith.addf %28, %30 : vector<32x128xf32>
    %32 = arith.addf %3, %31 : vector<32x128xf32>
    %cst_17 = arith.constant 0.000000e+00 : f32
    %33 = vector.broadcast %cst_17 : f32 to vector<32x128xf32>
    %34 = arith.maximumf %32, %33 : vector<32x128xf32>
    %35 = vector.shape_cast %34 : vector<32x128xf32> to vector<2x16x128xf32>
    %c0_18 = arith.constant 0 : index
    %c0_19 = arith.constant 0 : index
    %c0_20 = arith.constant 0 : index
    %36 = vector.load %arg5[%c0_18, %c0_19, %c0_20] : memref<2x16x128xf32, #tpu.memory_space<vmem>>, vector<2x16x128xf32>
    tpu.vector_store %arg5[%c0_18, %c0_19, %c0_20], %35 {strides = array<i32>} : memref<2x16x128xf32, #tpu.memory_space<vmem>>, vector<2x16x128xf32>,
    return
  }
}

</mosaic_0001>

<bundles_post_ra>
// kernel: inception_backbone_fwd.7
= control target key start
LH: loop header
LB: loop body
LE: loop exit
PB: predicated region body
PF: predicated region fallthrough
CT: control target
= control target key end

     0   :  { %s435_s2 = inlined_call_operand.vmem [shape: f32[128,128], index: 2, kind: input, shape index: {}]   ;;  %s436_s0 = inlined_call_operand.vmem [shape: f32[2,16,128], index: 0, kind: input, shape index: {}]   ;;  %s437_s3 = inlined_call_operand.vmem [shape: f32[1,128], index: 3, kind: input, shape index: {}]   ;;  %s438_s4 = inlined_call_operand.vmem [shape: f32[1,128], index: 4, kind: input, shape index: {}]   ;;  %s439_s1 = inlined_call_operand.vmem [shape: f32[2,16,128], index: 1, kind: input, shape index: {}]   ;;  %s440_s5 = inlined_call_operand.vmem [shape: f32[2,16,128], index: 5, kind: output, shape index: {}]  }
   0x1   :  { %v28_v0 = vld [vmem:[%s435_s2] sm:$0xff]  ;;  %v29_v1 = vld [vmem:[%s435_s2 + $0x8] sm:$0xff]  ;;  %v30_v2 = vld [vmem:[%s435_s2 + $0x10] sm:$0xff] }
   0x2   :  { %v265_v3 = vpack.c.bf16 %v29_v1, %v28_v0  ;;  %v31_v4 = vld [vmem:[%s435_s2 + $0x18] sm:$0xff]  ;;  %v32_v6 = vld [vmem:[%s435_s2 + $0x20] sm:$0xff]  ;;  %v33_v7 = vld [vmem:[%s435_s2 + $0x28] sm:$0xff] }
   0x3   :  { %v269_v5 = vpack.c.bf16 %v31_v4, %v30_v2  ;;  %v273_v8 = vpack.c.bf16 %v33_v7, %v32_v6  ;;  %v20_v9 = vld [vmem:[%s436_s0] sm:$0xff]  ;;  %v34_v10 = vld [vmem:[%s435_s2 + $0x30] sm:$0xff]  ;;  %v35_v11 = vld [vmem:[%s435_s2 + $0x38] sm:$0xff] }
   0x4   :  { %266 = vmatprep.subr.bf16.mxu0 %v265_v3  ;;  %297 = vmatprep.subr.bf16.mxu1 %v265_v3  ;;  %v22_v12 = vld [vmem:[%s436_s0 + $0x10] sm:$0xff]  ;;  %v277_v13 = vpack.c.bf16 %v35_v11, %v34_v10  ;;  %v36_v14 = vld [vmem:[%s435_s2 + $0x40] sm:$0xff]  ;;  %v37_v15 = vld [vmem:[%s435_s2 + $0x48] sm:$0xff] }
   0x5   :  { %268 = vmatpush3.bf16.msra.mxu0 %v265_v3  ;;  %305 = vmatpush3.bf16.msra.mxu1 %v265_v3  ;;  %v281_v16 = vpack.c.bf16 %v37_v15, %v36_v14  ;;  %v38_v17 = vld [vmem:[%s435_s2 + $0x50] sm:$0xff]  ;;  %v39_v18 = vld [vmem:[%s435_s2 + $0x58] sm:$0xff]  ;;  %v40_v20 = vld [vmem:[%s435_s2 + $0x60] sm:$0xff] }
   0x6   :  { %270 = vmatprep.subr.bf16.mxu0 %v269_v5  ;;  %298 = vmatprep.subr.bf16.mxu1 %v269_v5  ;;  %v285_v19 = vpack.c.bf16 %v39_v18, %v38_v17  ;;  %v41_v21 = vld [vmem:[%s435_s2 + $0x68] sm:$0xff]  ;;  %v42_v23 = vld [vmem:[%s435_s2 + $0x70] sm:$0xff]  ;;  %v43_v24 = vld [vmem:[%s435_s2 + $0x78] sm:$0xff] }
   0x7   :  { %259 = vmatprep.mubr.f32.mxu0 %v20_v9  ;;  %262 = vmatprep.mubr.f32.mxu1 %v22_v12  ;;  %v289_v22 = vpack.c.bf16 %v41_v21, %v40_v20  ;;  %v293_v25 = vpack.c.bf16 %v43_v24, %v42_v23  ;;  %v21_v26 = vld [vmem:[%s436_s0 + $0x8] sm:$0xff]  ;;  %v23_v27 = vld [vmem:[%s436_s0 + $0x18] sm:$0xff]  ;;  %v205_v1 = vld [vmem:[%s437_s3] ss:$0 sm:$0xff] }
   0x8   :  { %v206_v6 = vld [vmem:[%s438_s4] ss:$0 sm:$0xff]  ;;  %v25_v12 = vld [vmem:[%s439_s1 + $0x8] sm:$0xff]  ;;  %v27_v14 = vld [vmem:[%s439_s1 + $0x18] sm:$0xff] }
   0x9   :  { %272 = vmatpush3.bf16.msra.mxu0 %v269_v5  ;;  %306 = vmatpush3.bf16.msra.mxu1 %v269_v5  ;;  %v24_v7 = vld [vmem:[%s439_s1] sm:$0xff] }
   0xa   :  { %274 = vmatprep.subr.bf16.mxu0 %v273_v8  ;;  %299 = vmatprep.subr.bf16.mxu1 %v273_v8 }
   0xd   :  { %276 = vmatpush3.bf16.msra.mxu0 %v273_v8  ;;  %307 = vmatpush3.bf16.msra.mxu1 %v273_v8 }
   0xe   :  { %278 = vmatprep.subr.bf16.mxu0 %v277_v13  ;;  %300 = vmatprep.subr.bf16.mxu1 %v277_v13 }
  0x11   :  { %280 = vmatpush3.bf16.msra.mxu0 %v277_v13  ;;  %308 = vmatpush3.bf16.msra.mxu1 %v277_v13  ;;  %v26_v13 = vld [vmem:[%s439_s1 + $0x10] sm:$0xff] }
  0x12   :  { %282 = vmatprep.subr.bf16.mxu0 %v281_v16  ;;  %301 = vmatprep.subr.bf16.mxu1 %v281_v16 }
  0x15   :  { %284 = vmatpush3.bf16.msra.mxu0 %v281_v16  ;;  %309 = vmatpush3.bf16.msra.mxu1 %v281_v16 }
  0x16   :  { %286 = vmatprep.subr.bf16.mxu0 %v285_v19  ;;  %302 = vmatprep.subr.bf16.mxu1 %v285_v19 }
  0x19   :  { %288 = vmatpush3.bf16.msra.mxu0 %v285_v19  ;;  %310 = vmatpush3.bf16.msra.mxu1 %v285_v19 }
  0x1a   :  { %290 = vmatprep.subr.bf16.mxu0 %v289_v22  ;;  %303 = vmatprep.subr.bf16.mxu1 %v289_v22 }
  0x1d   :  { %292 = vmatpush3.bf16.msra.mxu0 %v289_v22  ;;  %311 = vmatpush3.bf16.msra.mxu1 %v289_v22 }
  0x1e   :  { %294 = vmatprep.subr.bf16.mxu0 %v293_v25  ;;  %304 = vmatprep.subr.bf16.mxu1 %v293_v25 }
  0x21   :  { %296 = vmatpush3.bf16.msra.mxu0 %v293_v25  ;;  %312 = vmatpush3.bf16.msra.mxu1 %v293_v25 }
  0x24   :  { %260 = vmatmul.mubr.f32.vlgmr.msra.gmra.mrb[0].mxu0 %v21_v26  ;;  %263 = vmatmul.mubr.f32.vlgmr.msra.gmra.mrb[0].mxu1 %v23_v27 }
  0xf7   :  { %v261_v28 = vpop.f32.mrb[0].mxu0  ;;  %v264_v29 = vpop.f32.mrb[0].mxu1 }
  0xf8   :  { %v141_v30 = vmul.f32 %v261_v28, %v261_v28  ;;  %v110_v31 = vpop.f32.mrb[1].mxu0  ;;  %v120_v32 = vpop.f32.mrb[1].mxu1  ;;  %v143_v38 = vmul.f32 %v264_v29, %v264_v29 }
  0xf9   :  { %v129_v33 = vadd.f32 %v261_v28, %v110_v31  ;;  %v140_v34 = vmul.f32 %v110_v31, %v110_v31  ;;  %v142_v35 = vmul.f32 %v120_v32, %v120_v32 }
  0xfb   :  { %v144_v36 = vadd.f32 %v141_v30, %v140_v34  ;;  %v130_v37 = vadd.f32 %v129_v33, %v120_v32 }
  0xfd   :  { %v131_v39 = vadd.f32 %v264_v29, %v130_v37  ;;  %v145_v40 = vadd.f32 %v144_v36, %v142_v35 }
  0xff   :  { %v132_v41 = vrot.slane %v131_v39, 4  ;;  %v146_v42 = vadd.f32 %v145_v40, %v143_v38 }
 0x101   :  { %v133_v43 = vadd.f32 %v132_v41, %v131_v39  ;;  %v147_v44 = vrot.slane %v146_v42, 4 }
 0x103   :  { %v134_v45 = vrot.slane %v133_v43, 2  ;;  %v148_v46 = vadd.f32 %v147_v44, %v146_v42 }
 0x105   :  { %v135_v47 = vadd.f32 %v134_v45, %v133_v43  ;;  %v149_v48 = vrot.slane %v148_v46, 2 }
 0x107   :  { %v136_v49 = vrot.slane %v135_v47, 1  ;;  %v150_v50 = vadd.f32 %v149_v48, %v148_v46 }
 0x109   :  { %v137_v51 = vadd.f32 %v136_v49, %v135_v47  ;;  %v151_v52 = vrot.slane %v150_v50, 1 }
 0x10b   :  { %v139_v53 = vmul.f32 0.03125, %v137_v51  ;;  %v152_v54 = vadd.f32 %v151_v52, %v150_v50 }
 0x10d   :  { %v153_v55 = vmul.f32 0.03125, %v152_v54  ;;  %v154_v56 = vmul.f32 %v139_v53, %v139_v53  ;;  %v157_v57 = vsub.f32 %v110_v31, %v139_v53  ;;  %v158_v58 = vsub.f32 %v261_v28, %v139_v53 }
 0x10e   :  { %v159_v59 = vsub.f32 %v120_v32, %v139_v53  ;;  %v160_v60 = vsub.f32 %v264_v29, %v139_v53 }
 0x10f   :  { %v155_v61 = vsub.f32 %v153_v55, %v154_v56 }
 0x111   :  { %v156_v62 = vmax.f32 %v155_v61, 0.0 }
 0x113   :  { %v161_v63 = vadd.f32 1e-05, %v156_v62 }
 0x115   :  { %313 = vrsqrt.f32 %v161_v63 }
 0x11f   :  { %v314_v0 = vpop.eup %313 }
 0x120   :  { %v163_v2 = vmul.f32 %v314_v0, %v157_v57  ;;  %v164_v3 = vmul.f32 %v314_v0, %v158_v58  ;;  %v165_v4 = vmul.f32 %v314_v0, %v159_v59  ;;  %v166_v5 = vmul.f32 %v314_v0, %v160_v60 }
 0x122   :  { %v174_v8 = vmul.f32 %v205_v1, %v163_v2  ;;  %v175_v9 = vmul.f32 %v205_v1, %v164_v3  ;;  %v176_v10 = vmul.f32 %v205_v1, %v165_v4  ;;  %v177_v11 = vmul.f32 %v205_v1, %v166_v5 }
 0x124   :  { %v185_v15 = vadd.f32 %v206_v6, %v174_v8  ;;  %v186_v16 = vadd.f32 %v206_v6, %v175_v9  ;;  %v187_v17 = vadd.f32 %v206_v6, %v176_v10  ;;  %v188_v18 = vadd.f32 %v206_v6, %v177_v11 }
 0x126   :  { %v189_v19 = vadd.f32 %v185_v15, %v24_v7  ;;  %v190_v20 = vadd.f32 %v186_v16, %v25_v12  ;;  %v191_v21 = vadd.f32 %v187_v17, %v26_v13  ;;  %v192_v22 = vadd.f32 %v188_v18, %v27_v14 }
 0x128   :  { %v193_v23 = vmax.f32 %v189_v19, 0.0  ;;  %v194_v24 = vmax.f32 %v190_v20, 0.0  ;;  %v195_v25 = vmax.f32 %v191_v21, 0.0  ;;  %v196_v26 = vmax.f32 %v192_v22, 0.0 }
 0x12a   :  { %197 = vst [vmem:[%s440_s5] sm:$0xff] %v193_v23  ;;  %198 = vst [vmem:[%s440_s5 + $0x8] sm:$0xff] %v194_v24 }
 0x12b   :  { %199 = vst [vmem:[%s440_s5 + $0x10] sm:$0xff] %v195_v25  ;;  %200 = vst [vmem:[%s440_s5 + $0x18] sm:$0xff] %v196_v26 }

// kernel: inception_backbone_fwd.4
= control target key start
LH: loop header
LB: loop body
LE: loop exit
PB: predicated region body
PF: predicated region fallthrough
CT: control target
= control target key end

     0   :  { %vm686_vm0 = vcmask 1040384   ;;  %vm152_vm1 = vcmask 1046528   ;;  %vm352_vm2 = vcmask 1045504   ;;  %vm132_vm3 = vcmask 1041408   ;;  %s1485_s1 = inlined_call_operand.vmem [shape: f32[128,8], index: 1, kind: input, shape index: {}]   ;;  %s1486_s0 = inlined_call_operand.vmem [shape: f32[2,16,128], index: 0, kind: input, shape index: {}]   ;;  %s1487_s2 = inlined_call_operand.vmem [shape: f32[5,8,128], index: 2, kind: input, shape index: {}]   ;;  %s1488_s3 = inlined_call_operand.vmem [shape: f32[128,128], index: 3, kind: input, shape index: {}]   ;;  %s1489_s4 = inlined_call_operand.vmem [shape: f32[1,128], index: 4, kind: input, shape index: {}]   ;;  %s1490_s5 = inlined_call_operand.vmem [shape: f32[1,128], index: 5, kind: input, shape index: {}]   ;;  %s1491_s6 = inlined_call_operand.vmem [shape: f32[2,16,128], index: 6, kind: output, shape index: {}]  }
   0x1   :  { %v27_v0 = vld [vmem:[%s1485_s1] sm:$0xff]  ;;  %v28_v1 = vld [vmem:[%s1485_s1 + $0x8] sm:$0xff]  ;;  %v29_v2 = vld [vmem:[%s1485_s1 + $0x10] sm:$0xff]  ;;  %vm165_vm4 = vcmask 64512   ;;  %vm462_vm5 = vcmask 1044480   ;;  %vm572_vm6 = vcmask 1043456  }
   0x2   :  { %v1127_v3 = vpack.c.bf16 %v28_v1, %v27_v0  ;;  %v30_v4 = vld [vmem:[%s1485_s1 + $0x18] sm:$0xff]  ;;  %v31_v6 = vld [vmem:[%s1485_s1 + $0x20] sm:$0xff]  ;;  %v32_v7 = vld [vmem:[%s1485_s1 + $0x28] sm:$0xff] }
   0x3   :  { %v1131_v5 = vpack.c.bf16 %v30_v4, %v29_v2  ;;  %v1135_v8 = vpack.c.bf16 %v32_v7, %v31_v6  ;;  %v33_v9 = vld [vmem:[%s1485_s1 + $0x30] sm:$0xff]  ;;  %v23_v10 = vld [vmem:[%s1486_s0] sm:$0xff]  ;;  %v24_v11 = vld [vmem:[%s1486_s0 + $0x8] sm:$0xff] }
   0x4   :  { %1128 = vmatprep.subr.bf16.mxu0 %v1127_v3  ;;  %v34_v12 = vld [vmem:[%s1485_s1 + $0x38] sm:$0xff]  ;;  %1043 = vmatprep.mubr.f32.mxu0 %v23_v10  ;;  %v687_v13 = vrot.slane %v23_v10, 7  ;;  %v688_v14 = vrot.slane %v24_v11, 7  ;;  %v25_v15 = vld [vmem:[%s1486_s0 + $0x10] sm:$0xff]  ;;  %v35_v24 = vld [vmem:[%s1485_s1 + $0x40] sm:$0xff] }
   0x5   :  { %1130 = vmatpush3.bf16.msra.mxu0 %v1127_v3  ;;  %v26_v16 = vld [vmem:[%s1486_s0 + $0x18] sm:$0xff]  ;;  %v690_v17 = vrot.slane %v25_v15, 7  ;;  %v1139_v21 = vpack.c.bf16 %v34_v12, %v33_v9  ;;  %v36_v25 = vld [vmem:[%s1485_s1 + $0x48] sm:$0xff]  ;;  %v37_v30 = vld [vmem:[%s1485_s1 + $0x50] sm:$0xff] }
   0x6   :  { %1132 = vmatprep.subr.bf16.mxu0 %v1131_v5  ;;  %v691_v18 = vrot.slane %v26_v16, 7  ;;  %v1285_v19 = vsel %vm686_vm0, %v687_v13, %v688_v14  ;;  %v1288_v20 = vsel %vm686_vm0, %v688_v14, -inf  ;;  %v1143_v29 = vpack.c.bf16 %v36_v25, %v35_v24  ;;  %v38_v31 = vld [vmem:[%s1485_s1 + $0x58] sm:$0xff]  ;;  %v39_v33 = vld [vmem:[%s1485_s1 + $0x60] sm:$0xff]  ;;  %v40_v34 = vld [vmem:[%s1485_s1 + $0x68] sm:$0xff] }
   0x7   :  { %v708_v22 = vrot.slane %v1285_v19, 1  ;;  %v710_v23 = vrot.slane %v1288_v20, 1  ;;  %v1147_v32 = vpack.c.bf16 %v38_v31, %v37_v30  ;;  %v1151_v35 = vpack.c.bf16 %v40_v34, %v39_v33  ;;  %v41_v36 = vld [vmem:[%s1485_s1 + $0x70] sm:$0xff]  ;;  %v42_v37 = vld [vmem:[%s1485_s1 + $0x78] sm:$0xff]  ;;  %v920_v40 = vld [vmem:[%s1487_s2 + $0x8] sm:$0xff] }
   0x8   :  { %v1299_v26 = vsel %vm686_vm0, %v690_v17, %v691_v18  ;;  %v1155_v38 = vpack.c.bf16 %v42_v37, %v41_v36  ;;  %v929_v39 = vld [vmem:[%s1487_s2 + $0x10] sm:$0xff]  ;;  %v1330_v41 = vld [vmem:[%s1487_s2 + $0x18] sm:$0xff]  ;;  %v1336_v42 = vld [vmem:[%s1487_s2] sm:$0xff]  ;;  %v699_v43 = vsel %vm686_vm0, -inf, %v687_v13  ;;  %v700_v45 = vsel %vm686_vm0, -inf, %v690_v17 }
   0x9   :  { %1134 = vmatpush3.bf16.msra.mxu0 %v1131_v5  ;;  %v711_v27 = vsel %vm152_vm1, %v708_v22, %v710_v23  ;;  %1065 = vmatprep.subr.mxu1 %v929_v39  ;;  %v707_v44 = vrot.slane %v699_v43, 1  ;;  %v702_v46 = vsel %vm686_vm0, %v691_v18, -inf  ;;  %v725_v47 = vrot.slane %v699_v43, 2 }
   0xa   :  { %1136 = vmatprep.subr.bf16.mxu0 %v1135_v8  ;;  %v722_v28 = vmax.f32 %v1285_v19, %v711_v27  ;;  %1066 = vmatpush3.msra.mxu1 %v929_v39  ;;  %v728_v48 = vrot.slane %v1288_v20, 2  ;;  %v712_v49 = vrot.slane %v700_v45, 1  ;;  %v713_v50 = vrot.slane %v1299_v26, 1 }
   0xb   :  { %1073 = vmatprep.subr.mxu1 %v1330_v41  ;;  %v715_v51 = vrot.slane %v702_v46, 1  ;;  %v709_v52 = vsel %vm152_vm1, %v707_v44, %v708_v22  ;;  %v726_v53 = vrot.slane %v1285_v19, 2  ;;  %v730_v54 = vrot.slane %v700_v45, 2 }
   0xc   :  { %v733_v55 = vrot.slane %v702_v46, 2  ;;  %v721_v56 = vmax.f32 %v699_v43, %v709_v52  ;;  %v714_v61 = vsel %vm152_vm1, %v712_v49, %v713_v50  ;;  %v731_v62 = vrot.slane %v1299_v26, 2 }
   0xd   :  { %1138 = vmatpush3.bf16.msra.mxu0 %v1135_v8  ;;  %v727_v57 = vsel %vm352_vm2, %v725_v47, %v726_v53  ;;  %v729_v58 = vsel %vm352_vm2, %v726_v53, %v728_v48  ;;  %v723_v63 = vmax.f32 %v700_v45, %v714_v61  ;;  %v716_v0 = vsel %vm152_vm1, %v713_v50, %v715_v51 }
   0xe   :  { %1140 = vmatprep.subr.bf16.mxu0 %v1139_v21  ;;  %v1348_v59 = vmax.f32 %v721_v56, %v727_v57  ;;  %v1350_v60 = vmax.f32 %v722_v28, %v729_v58  ;;  %v732_v1 = vsel %vm352_vm2, %v730_v54, %v731_v62  ;;  %v724_v2 = vmax.f32 %v1299_v26, %v716_v0  ;;  %v744_v56 = vld [vmem:[%s1488_s3 + $0x8] sm:$0xff] }
   0xf   :  { %v734_v3 = vsel %vm352_vm2, %v731_v62, %v733_v55  ;;  %v1358_v4 = vmax.f32 %v723_v63, %v732_v1 }
  0x10   :  { %v1360_v5 = vmax.f32 %v724_v2, %v734_v3  ;;  %v745_v2 = vld [vmem:[%s1488_s3 + $0x10] sm:$0xff]  ;;  %v746_v3 = vld [vmem:[%s1488_s3 + $0x18] sm:$0xff] }
  0x11   :  { %1142 = vmatpush3.bf16.msra.mxu0 %v1139_v21 }
  0x12   :  { %1144 = vmatprep.subr.bf16.mxu0 %v1143_v29 }
  0x15   :  { %1146 = vmatpush3.bf16.msra.mxu0 %v1143_v29 }
  0x16   :  { %1148 = vmatprep.subr.bf16.mxu0 %v1147_v32 }
  0x19   :  { %1150 = vmatpush3.bf16.msra.mxu0 %v1147_v32 }
  0x1a   :  { %1152 = vmatprep.subr.bf16.mxu0 %v1151_v35 }
  0x1d   :  { %1154 = vmatpush3.bf16.msra.mxu0 %v1151_v35 }
  0x1e   :  { %1156 = vmatprep.subr.bf16.mxu0 %v1155_v38 }
  0x21   :  { %1158 = vmatpush3.bf16.msra.mxu0 %v1155_v38 }
  0x22   :  { %1049 = vmatprep.subr.mxu0 %v920_v40 }
  0x24   :  { %1044 = vmatmul.mubr.f32.vlgmr.msra.gmra.mrb[0].mxu0 %v24_v11 }
  0x25   :  { %1046 = vmatprep.mubr.f32.mxu0 %v25_v15  ;;  %1050 = vmatpush3.msra.mxu0 %v920_v40  ;;  %v939_v40 = vld [vmem:[%s1487_s2 + $0x20] sm:$0xff] }
  0x26   :  { %1057 = vmatprep.subr.mxu0 %v1336_v42 }
  0x28   :  { %1047 = vmatmul.mubr.f32.gmra.mrb[2].mxu0 %v26_v16 }
  0xf7   :  { %v1045_v6 = vpop.f32.mrb[0].mxu0 }
  0xf8   :  { %v134_v7 = vrot.slane %v1045_v6, 6  ;;  %v109_v8 = vpop.f32.mrb[1].mxu0  ;;  %v1163_v6 = vpack.c.bf16 %v746_v3, %v745_v2 }
  0xf9   :  { %v133_v9 = vrot.slane %v109_v8, 6  ;;  %v748_v8 = vld [vmem:[%s1488_s3 + $0x28] sm:$0xff] }
  0xfa   :  { %v1363_v10 = vsel %vm132_vm3, %v134_v7, 0.0 }
  0xfb   :  { %v156_v11 = vrot.slane %v1363_v10, 1  ;;  %v356_v12 = vrot.slane %v1363_v10, 2  ;;  %v466_v13 = vrot.slane %v1363_v10, 3  ;;  %v1048_v14 = vpop.f32.mrb[2].mxu0  ;;  %v576_v15 = vrot.slane %v1363_v10, 4  ;;  %v749_v10 = vld [vmem:[%s1488_s3 + $0x30] sm:$0xff] }
  0xfc   :  { %v135_v16 = vsel %vm132_vm3, %v133_v9, %v134_v7  ;;  %v143_v17 = vsel %vm132_vm3, 0.0, %v133_v9  ;;  %v137_v18 = vrot.slane %v1048_v14, 6  ;;  %v119_v19 = vpop.f32.mrb[3].mxu0  ;;  %v747_v7 = vld [vmem:[%s1488_s3 + $0x20] sm:$0xff]  ;;  %v752_v14 = vld [vmem:[%s1488_s3 + $0x48] sm:$0xff] }
  0xfd   :  { %v136_v20 = vrot.slane %v119_v19, 6  ;;  %v153_v21 = vrot.slane %v143_v17, 1  ;;  %v154_v22 = vrot.slane %v135_v16, 1  ;;  %v353_v23 = vrot.slane %v143_v17, 2  ;;  %v756_v19 = vld [vmem:[%s1488_s3 + $0x68] sm:$0xff] }
  0xfe   :  { %v146_v24 = vsel %vm132_vm3, %v137_v18, 0.0  ;;  %v354_v25 = vrot.slane %v135_v16, 2  ;;  %v463_v26 = vrot.slane %v143_v17, 3  ;;  %v464_v27 = vrot.slane %v135_v16, 3 }
  0xff   :  { %v161_v28 = vrot.slane %v146_v24, 1  ;;  %v361_v29 = vrot.slane %v146_v24, 2  ;;  %v471_v30 = vrot.slane %v146_v24, 3  ;;  %v581_v31 = vrot.slane %v146_v24, 4 }
 0x100   :  { %v138_v32 = vsel %vm132_vm3, %v136_v20, %v137_v18  ;;  %v144_v33 = vsel %vm132_vm3, 0.0, %v136_v20  ;;  %v155_v34 = vsel %vm152_vm1, %v153_v21, %v154_v22  ;;  %v355_v35 = vsel %vm352_vm2, %v353_v23, %v354_v25  ;;  %v755_v18 = vld [vmem:[%s1488_s3 + $0x60] sm:$0xff]  ;;  %v757_v21 = vld [vmem:[%s1488_s3 + $0x70] sm:$0xff] }
 0x101   :  { %1051 = vmatprep.mubr.msk.f32.mxu0 %vm165_vm4, %v155_v34  ;;  %1067 = vmatprep.mubr.msk.f32.mxu1 %vm165_vm4, %v355_v35  ;;  %v157_v36 = vsel %vm152_vm1, %v154_v22, %v156_v11  ;;  %v357_v37 = vsel %vm352_vm2, %v354_v25, %v356_v12  ;;  %v158_v38 = vrot.slane %v144_v33, 1  ;;  %v159_v39 = vrot.slane %v138_v32, 1  ;;  %v750_v11 = vld [vmem:[%s1488_s3 + $0x38] sm:$0xff] }
 0x102   :  { %1052 = vmatmul.mubr.msk.f32.vlgmr.msra.gmra.mrb[4].mxu0 %vm165_vm4, %v157_v36  ;;  %1068 = vmatmul.mubr.msk.f32.vlgmr.msra.gmra.mrb[0].mxu1 %vm165_vm4, %v357_v37  ;;  %v358_v43 = vrot.slane %v144_v33, 2  ;;  %v359_v44 = vrot.slane %v138_v32, 2  ;;  %v465_v45 = vsel %vm462_vm5, %v463_v26, %v464_v27  ;;  %v467_v46 = vsel %vm462_vm5, %v464_v27, %v466_v13  ;;  %v751_v13 = vld [vmem:[%s1488_s3 + $0x40] sm:$0xff]  ;;  %v758_v22 = vld [vmem:[%s1488_s3 + $0x78] sm:$0xff] }
 0x103   :  { %1074 = vmatpush3.msra.mxu1 %v1330_v41  ;;  %v160_v47 = vsel %vm152_vm1, %v158_v38, %v159_v39  ;;  %v162_v48 = vsel %vm152_vm1, %v159_v39, %v161_v28  ;;  %1058 = vmatpush3.msra.mxu0 %v1336_v42  ;;  %v468_v49 = vrot.slane %v144_v33, 3  ;;  %v469_v50 = vrot.slane %v138_v32, 3  ;;  %v743_v42 = vld [vmem:[%s1488_s3] sm:$0xff] }
 0x104   :  { %1054 = vmatprep.mubr.msk.f32.mxu0 %vm165_vm4, %v160_v47  ;;  %v360_v51 = vsel %vm352_vm2, %v358_v43, %v359_v44  ;;  %v362_v52 = vsel %vm352_vm2, %v359_v44, %v361_v29  ;;  %1081 = vmatprep.subr.mxu1 %v939_v40  ;;  %v573_v53 = vrot.slane %v143_v17, 4  ;;  %v574_v54 = vrot.slane %v135_v16, 4 }
 0x105   :  { %1070 = vmatprep.mubr.msk.f32.mxu1 %vm165_vm4, %v360_v51  ;;  %v470_v41 = vsel %vm462_vm5, %v468_v49, %v469_v50  ;;  %v472_v55 = vsel %vm462_vm5, %v469_v50, %v471_v30  ;;  %v578_v57 = vrot.slane %v144_v33, 4  ;;  %v579_v58 = vrot.slane %v138_v32, 4 }
 0x106   :  { %1055 = vmatmul.mubr.msk.f32.gmra.mrb[6].mxu0 %vm165_vm4, %v162_v48  ;;  %1071 = vmatmul.mubr.msk.f32.gmra.mrb[2].mxu1 %vm165_vm4, %v362_v52  ;;  %v575_v61 = vsel %vm572_vm6, %v573_v53, %v574_v54  ;;  %v577_v62 = vsel %vm572_vm6, %v574_v54, %v576_v15  ;;  %v1159_v1 = vpack.c.bf16 %v744_v56, %v743_v42 }
 0x107   :  { %1059 = vmatprep.mubr.msk.f32.mxu0 %vm165_vm4, %v143_v17  ;;  %1075 = vmatprep.mubr.msk.f32.mxu1 %vm165_vm4, %v465_v45  ;;  %v580_v63 = vsel %vm572_vm6, %v578_v57, %v579_v58  ;;  %v582_v0 = vsel %vm572_vm6, %v579_v58, %v581_v31  ;;  %v1167_v9 = vpack.c.bf16 %v748_v8, %v747_v7 }
 0x108   :  { %v1171_v12 = vpack.c.bf16 %v750_v11, %v749_v10  ;;  %v1175_v15 = vpack.c.bf16 %v752_v14, %v751_v13  ;;  %v1183_v20 = vpack.c.bf16 %v756_v19, %v755_v18  ;;  %v1187_v23 = vpack.c.bf16 %v758_v22, %v757_v21  ;;  %v945_v11 = vld [vmem:[%s1490_s5] ss:$0 sm:$0xff] }
 0x10a   :  { %1060 = vmatmul.mubr.msk.f32.vlgmr.msra.gmra.mrb[4].mxu0 %vm165_vm4, %v135_v16  ;;  %1076 = vmatmul.mubr.msk.f32.vlgmr.msra.gmra.mrb[0].mxu1 %vm165_vm4, %v467_v46  ;;  %v753_v16 = vld [vmem:[%s1488_s3 + $0x50] sm:$0xff] }
 0x10b   :  { %1082 = vmatpush3.msra.mxu1 %v939_v40  ;;  %1062 = vmatprep.mubr.msk.f32.mxu0 %vm165_vm4, %v144_v33 }
 0x10c   :  { %1078 = vmatprep.mubr.msk.f32.mxu1 %vm165_vm4, %v470_v41  ;;  %1160 = vmatprep.subr.bf16.mxu1 %v1159_v1 }
 0x10e   :  { %1063 = vmatmul.mubr.msk.f32.gmra.mrb[6].mxu0 %vm165_vm4, %v138_v32  ;;  %1079 = vmatmul.mubr.msk.f32.gmra.mrb[2].mxu1 %vm165_vm4, %v472_v55 }
 0x10f   :  { %1083 = vmatprep.mubr.msk.f32.mxu1 %vm165_vm4, %v575_v61 }
 0x112   :  { %1084 = vmatmul.mubr.msk.f32.vlgmr.msra.gmra.mrb[0].mxu1 %vm165_vm4, %v577_v62 }
 0x113   :  { %1162 = vmatpush3.bf16.msra.mxu1 %v1159_v1  ;;  %1086 = vmatprep.mubr.msk.f32.mxu1 %vm165_vm4, %v580_v63 }
 0x114   :  { %1164 = vmatprep.subr.bf16.mxu1 %v1163_v6 }
 0x116   :  { %1087 = vmatmul.mubr.msk.f32.gmra.mrb[2].mxu1 %vm165_vm4, %v582_v0 }
 0x117   :  { %1166 = vmatpush3.bf16.msra.mxu1 %v1163_v6  ;;  %1121 = vmatprep.mubr.f32.mxu1 %v1348_v59  ;;  %v754_v59 = vld [vmem:[%s1488_s3 + $0x58] sm:$0xff]  ;;  %v944_v6 = vld [vmem:[%s1489_s4] ss:$0 sm:$0xff] }
 0x118   :  { %1168 = vmatprep.subr.bf16.mxu1 %v1167_v9  ;;  %v1179_v17 = vpack.c.bf16 %v754_v59, %v753_v16 }
 0x11b   :  { %1170 = vmatpush3.bf16.msra.mxu1 %v1167_v9 }
 0x11c   :  { %1172 = vmatprep.subr.bf16.mxu1 %v1171_v12 }
 0x11f   :  { %1174 = vmatpush3.bf16.msra.mxu1 %v1171_v12 }
 0x120   :  { %1176 = vmatprep.subr.bf16.mxu1 %v1175_v15 }
 0x123   :  { %1178 = vmatpush3.bf16.msra.mxu1 %v1175_v15 }
 0x124   :  { %1180 = vmatprep.subr.bf16.mxu1 %v1179_v17 }
 0x127   :  { %1182 = vmatpush3.bf16.msra.mxu1 %v1179_v17 }
 0x128   :  { %1184 = vmatprep.subr.bf16.mxu1 %v1183_v20 }
 0x12b   :  { %1186 = vmatpush3.bf16.msra.mxu1 %v1183_v20 }
 0x12c   :  { %1188 = vmatprep.subr.bf16.mxu1 %v1187_v23 }
 0x12f   :  { %1190 = vmatpush3.bf16.msra.mxu1 %v1187_v23 }
 0x132   :  { %1122 = vmatmul.mubr.f32.vlgmr.msra.gmra.mrb[0].mxu1 %v1350_v60 }
 0x133   :  { %1124 = vmatprep.mubr.f32.mxu1 %v1358_v4 }
 0x136   :  { %1125 = vmatmul.mubr.f32.gmra.mrb[2].mxu1 %v1360_v5 }
 0x1dd   :  { %v1061_v24 = vpop.f32.mrb[4].mxu0 }
 0x1de   :  { %v333_v25 = vpop.f32.mrb[5].mxu0 }
 0x1e1   :  { %v1064_v26 = vpop.f32.mrb[6].mxu0 }
 0x1e2   :  { %v343_v27 = vpop.f32.mrb[7].mxu0 }
 0x205   :  { %v1123_v28 = vpop.f32.mrb[0].mxu1 }
 0x206   :  { %v1191_v29 = vadd.f32 %v1123_v28, %v1061_v24  ;;  %v825_v30 = vpop.f32.mrb[1].mxu1 }
 0x207   :  { %v1192_v31 = vadd.f32 %v825_v30, %v333_v25 }
 0x208   :  { %v860_v32 = vmul.f32 %v1191_v29, %v1191_v29 }
 0x209   :  { %v848_v33 = vadd.f32 %v1192_v31, %v1191_v29  ;;  %v859_v34 = vmul.f32 %v1192_v31, %v1192_v31  ;;  %v1126_v35 = vpop.f32.mrb[2].mxu1 }
 0x20a   :  { %v1193_v36 = vadd.f32 %v1126_v35, %v1064_v26  ;;  %v835_v37 = vpop.f32.mrb[3].mxu1 }
 0x20b   :  { %v863_v38 = vadd.f32 %v860_v32, %v859_v34  ;;  %v1194_v60 = vadd.f32 %v835_v37, %v343_v27 }
 0x20c   :  { %v862_v40 = vmul.f32 %v1193_v36, %v1193_v36 }
 0x20d   :  { %v849_v39 = vadd.f32 %v1194_v60, %v848_v33  ;;  %v861_v4 = vmul.f32 %v1194_v60, %v1194_v60 }
 0x20f   :  { %v850_v5 = vadd.f32 %v1193_v36, %v849_v39  ;;  %v864_v43 = vadd.f32 %v863_v38, %v861_v4 }
 0x211   :  { %v851_v44 = vrot.slane %v850_v5, 4  ;;  %v865_v45 = vadd.f32 %v864_v43, %v862_v40 }
 0x213   :  { %v852_v46 = vadd.f32 %v851_v44, %v850_v5  ;;  %v866_v47 = vrot.slane %v865_v45, 4 }
 0x215   :  { %v853_v48 = vrot.slane %v852_v46, 2  ;;  %v867_v49 = vadd.f32 %v866_v47, %v865_v45 }
 0x217   :  { %v854_v50 = vadd.f32 %v853_v48, %v852_v46  ;;  %v868_v51 = vrot.slane %v867_v49, 2 }
 0x219   :  { %v855_v52 = vrot.slane %v854_v50, 1  ;;  %v869_v53 = vadd.f32 %v868_v51, %v867_v49 }
 0x21b   :  { %v856_v54 = vadd.f32 %v855_v52, %v854_v50  ;;  %v870_v41 = vrot.slane %v869_v53, 1 }
 0x21d   :  { %v858_v55 = vmul.f32 0.03125, %v856_v54  ;;  %v871_v42 = vadd.f32 %v870_v41, %v869_v53 }
 0x21f   :  { %v872_v56 = vmul.f32 0.03125, %v871_v42  ;;  %v873_v57 = vmul.f32 %v858_v55, %v858_v55  ;;  %v876_v58 = vsub.f32 %v1192_v31, %v858_v55  ;;  %v877_v61 = vsub.f32 %v1191_v29, %v858_v55 }
 0x220   :  { %v878_v62 = vsub.f32 %v1194_v60, %v858_v55  ;;  %v879_v63 = vsub.f32 %v1193_v36, %v858_v55 }
 0x221   :  { %v874_v0 = vsub.f32 %v872_v56, %v873_v57 }
 0x223   :  { %v875_v1 = vmax.f32 %v874_v0, 0.0 }
 0x225   :  { %v880_v2 = vadd.f32 1e-05, %v875_v1 }
 0x227   :  { %1211 = vrsqrt.f32 %v880_v2 }
 0x231   :  { %v1212_v3 = vpop.eup %1211 }
 0x232   :  { %v882_v7 = vmul.f32 %v1212_v3, %v876_v58  ;;  %v883_v8 = vmul.f32 %v1212_v3, %v877_v61  ;;  %v884_v9 = vmul.f32 %v1212_v3, %v878_v62  ;;  %v885_v10 = vmul.f32 %v1212_v3, %v879_v63 }
 0x234   :  { %v893_v12 = vmul.f32 %v944_v6, %v882_v7  ;;  %v894_v13 = vmul.f32 %v944_v6, %v883_v8  ;;  %v895_v14 = vmul.f32 %v944_v6, %v884_v9  ;;  %v896_v15 = vmul.f32 %v944_v6, %v885_v10 }
 0x236   :  { %v904_v16 = vadd.f32 %v945_v11, %v893_v12  ;;  %v905_v59 = vadd.f32 %v945_v11, %v894_v13  ;;  %v906_v17 = vadd.f32 %v945_v11, %v895_v14  ;;  %v907_v18 = vadd.f32 %v945_v11, %v896_v15 }
 0x238   :  { %v908_v19 = vmax.f32 %v904_v16, 0.0  ;;  %v909_v20 = vmax.f32 %v905_v59, 0.0  ;;  %v910_v21 = vmax.f32 %v906_v17, 0.0  ;;  %v911_v22 = vmax.f32 %v907_v18, 0.0 }
 0x23a   :  { %912 = vst [vmem:[%s1491_s6] sm:$0xff] %v908_v19  ;;  %913 = vst [vmem:[%s1491_s6 + $0x8] sm:$0xff] %v909_v20 }
 0x23b   :  { %914 = vst [vmem:[%s1491_s6 + $0x10] sm:$0xff] %v910_v21  ;;  %915 = vst [vmem:[%s1491_s6 + $0x18] sm:$0xff] %v911_v22 }

</bundles_post_ra>
